<compile_context>
chip_gen: v7x
topology: tpu7x:2x2x1
jax: 0.10.0
libtpu: 0.0.40
codegen_flags: <defaults>
</compile_context>

<pallas_src>
import jax
import jax.numpy as jnp
from jax.experimental import pallas as pl
from jax.experimental.pallas import tpu as pltpu

_MIB = 1024 * 1024


def _round_up(x, m):
    return (x + m - 1) // m * m


def _pad2d(x, rows, cols):
    return jnp.pad(x, ((0, rows - x.shape[0]), (0, cols - x.shape[1])))


def _tpu_kind():
    try:
        kind = jax.devices()[0].device_kind.lower()
    except Exception:
        kind = ""
    is_v5e = ("v5e" in kind) or ("v5 lite" in kind) or ("v5litepod" in kind)
    is_v7 = ("7x" in kind) or ("v7" in kind)
    return kind, is_v5e, is_v7


def _vmem_capacity_bytes():
    try:
        cap = int(getattr(pltpu.get_tpu_info(), "vmem_capacity_bytes"))
        if cap > 0:
            return cap
    except Exception:
        pass
    _, _, is_v7 = _tpu_kind()
    return 64 * _MIB if is_v7 else 128 * _MIB


def _pick_batch_tile(B, is_v5e, is_v7):
    """Largest batch tile whose padding waste stays <= ~12.5% of the batch."""
    b_pad = _round_up(B, 16)                       # bf16: 16 rows per packed tile
    tm_max = 128 if is_v5e else (256 if is_v7 else 512)
    tm = 16
    for cand in (512, 256, 128, 64, 32, 16):
        if cand > tm_max:
            continue
        waste = _round_up(b_pad, cand) - b_pad
        if waste <= b_pad // 8:
            tm = cand
            break
    b_pad = _round_up(b_pad, tm)
    # v7x has 2 TensorCores: make sure the parallel grid has >=2 steps.
    if is_v7:
        while b_pad // tm < 2 and tm > 16:
            tm //= 2
    return tm, b_pad


def _mlp_g_kernel(noise_ref, att_ref, w1n_ref, w1a_ref, b1_ref, w2_ref, b2_ref,
                  out_ref):
    """One batch tile of relu(leaky_relu(cat(noise,att)@W1+b1, 0.2)@W2+b2)."""
    # fc1: concat fused by splitting W1 along its rows -- two MXU dots that
    # accumulate into the same f32 result (mathematically identical to cat).
    z1 = jnp.dot(noise_ref[...], w1n_ref[...], preferred_element_type=jnp.float32)
    z1 = z1 + jnp.dot(att_ref[...], w1a_ref[...], preferred_element_type=jnp.float32)
    z1 = z1 + b1_ref[...]                              # f32 bias add (VPU)
    h1 = jnp.maximum(z1, 0.2 * z1)                     # LeakyReLU(0.2): mul + max

    # fc2 + ReLU: feed the MXU in bf16, accumulate in f32.
    z2 = jnp.dot(h1.astype(w2_ref.dtype), w2_ref[...],
                 preferred_element_type=jnp.float32)
    z2 = z2 + b2_ref[...]
    out_ref[...] = jnp.maximum(z2, 0.0).astype(out_ref.dtype)


def prepare_mlp_g_params(w1, b1, w2, b2, nz, *, compute_dtype=jnp.bfloat16):
    """Pad + cast weights ONCE; reuse the result across forward calls.

    w1: (nz+attSize, ngh)  b1: (ngh,)   w2: (ngh, resSize)  b2: (resSize,)
    (transpose of the PyTorch nn.Linear layout).
    """
    in_dim, ngh = w1.shape
    att_size = in_dim - nz
    res = w2.shape[1]
    assert w2.shape[0] == ngh and att_size > 0
    cdt = jnp.dtype(compute_dtype)

    nz_pad = _round_up(nz, 128)
    att_pad = _round_up(att_size, 128)
    ngh_pad = _round_up(ngh, 128)
    res_pad = _round_up(res, 128)

    return dict(
        w1n=_pad2d(w1[:nz].astype(cdt), nz_pad, ngh_pad),      # noise rows of W1
        w1a=_pad2d(w1[nz:].astype(cdt), att_pad, ngh_pad),     # att   rows of W1
        b1=_pad2d(b1.reshape(1, -1).astype(jnp.float32), 1, ngh_pad),
        w2=_pad2d(w2.astype(cdt), ngh_pad, res_pad),
        b2=_pad2d(b2.reshape(1, -1).astype(jnp.float32), 1, res_pad),
        dims=(nz, att_size, ngh, res, nz_pad, att_pad, ngh_pad, res_pad),
        compute_dtype=cdt,
    )


def mlp_g_forward(noise, att, params):
    """Fused MLP_G forward: noise (B, nz), att (B, attSize) -> (B, resSize) bf16."""
    nz, att_size, ngh, res, nz_pad, att_pad, ngh_pad, res_pad = params["dims"]
    cdt = params["compute_dtype"]
    itemsize = jnp.dtype(cdt).itemsize

    B = noise.shape[0]
    assert noise.shape[1] == nz and att.shape == (B, att_size)

    _, is_v5e, is_v7 = _tpu_kind()
    tm, b_pad = _pick_batch_tile(B, is_v5e, is_v7)
    grid = (b_pad // tm,)

    # Per-call activation padding only (weights were padded once in prepare).
    noise_p = _pad2d(noise.astype(cdt), b_pad, nz_pad)
    att_p = _pad2d(att.astype(cdt), b_pad, att_pad)

    row_tile = lambda shape: pl.BlockSpec(shape, lambda i: (i, 0))  # batch-tiled
    resident = lambda shape: pl.BlockSpec(shape, lambda i: (0, 0),  # stays in VMEM
                                          pipeline_mode=pl.Buffered(1))

    # ---- cost estimate + device-clamped VMEM budget. ----
    flops = 2 * B * ((nz + att_size) * ngh + ngh * res)
    weight_bytes = (nz_pad * ngh_pad + att_pad * ngh_pad + ngh_pad * res_pad) * itemsize
    bias_bytes = (ngh_pad + res_pad) * 4
    bytes_accessed = (b_pad * (nz_pad + att_pad) * itemsize
                      + weight_bytes + bias_bytes
                      + b_pad * res_pad * itemsize)
    vmem_est = (weight_bytes + bias_bytes                      # single-buffered
                + 2 * tm * (nz_pad + att_pad) * itemsize       # double-buffered inputs
                + 2 * tm * res_pad * itemsize                  # double-buffered output
                + tm * ngh_pad * 4)                            # f32 fc1 intermediate
    cap = max(32 * _MIB, _vmem_capacity_bytes() - 16 * _MIB)
    vmem_limit = int(min(max(vmem_est * 5 // 4, 32 * _MIB), cap))

    out_padded = pl.pallas_call(
        _mlp_g_kernel,
        out_shape=jax.ShapeDtypeStruct((b_pad, res_pad), cdt),
        grid=grid,
        in_specs=[
            row_tile((tm, nz_pad)),          # noise tile
            row_tile((tm, att_pad)),         # att tile
            resident((nz_pad, ngh_pad)),     # W1 (noise rows)
            resident((att_pad, ngh_pad)),    # W1 (att rows)
            resident((1, ngh_pad)),          # b1
            resident((ngh_pad, res_pad)),    # W2
            resident((1, res_pad)),          # b2
        ],
        out_specs=row_tile((tm, res_pad)),
        compiler_params=pltpu.CompilerParams(
            dimension_semantics=("parallel",),
            vmem_limit_bytes=vmem_limit,
        ),
        cost_estimate=pl.CostEstimate(
            flops=flops, transcendentals=0, bytes_accessed=bytes_accessed),
    )(noise_p, att_p, params["w1n"], params["w1a"], params["b1"],
      params["w2"], params["b2"])

    return out_padded[:B, :res]


def _reference_f32(noise, att, w1, b1, w2, b2):
    h = jnp.concatenate([noise, att], axis=1)
    z1 = h @ w1 + b1
    h1 = jnp.where(z1 > 0, z1, 0.2 * z1)
    z2 = h1 @ w2 + b2
    return jnp.maximum(z2, 0.0)


def _reference_bf16(noise, att, w1, b1, w2, b2):
    # Mimics the kernel's numerics: bf16 MXU inputs, f32 accumulation / VPU.
    h = jnp.concatenate([noise, att], axis=1).astype(jnp.bfloat16)
    z1 = jnp.dot(h, w1.astype(jnp.bfloat16),
                 preferred_element_type=jnp.float32) + b1
    h1 = jnp.where(z1 > 0, z1, 0.2 * z1)
    z2 = jnp.dot(h1.astype(jnp.bfloat16), w2.astype(jnp.bfloat16),
                 preferred_element_type=jnp.float32) + b2
    return jnp.maximum(z2, 0.0)


if __name__ == "__main__":
    # Small, MLP_G-consistent sizes: args.nz, args.attSize, args.ngh, args.resSize
    B, nz, att_size, ngh, res_size = 8, 16, 16, 64, 32

    key = jax.random.PRNGKey(0)
    k_noise, k_att, k_w1, k_w2 = jax.random.split(key, 4)

    noise = jax.random.normal(k_noise, (B, nz), dtype=jnp.float32)
    att = jax.random.normal(k_att, (B, att_size), dtype=jnp.float32)

    # weights_init: Linear weights ~ N(0, 0.02), biases = 0.
    # Stored as (in_features, out_features) == transpose of PyTorch layout.
    w1 = 0.02 * jax.random.normal(k_w1, (nz + att_size, ngh), dtype=jnp.float32)
    b1 = jnp.zeros((ngh,), dtype=jnp.float32)
    w2 = 0.02 * jax.random.normal(k_w2, (ngh, res_size), dtype=jnp.float32)
    b2 = jnp.zeros((res_size,), dtype=jnp.float32)

    # Weight padding/cast happens once; reuse `params` across forward calls.
    params = prepare_mlp_g_params(w1, b1, w2, b2, nz)
    out = jax.block_until_ready(mlp_g_forward(noise, att, params))
    assert out.shape == (B, res_size), out.shape
    assert out.dtype == jnp.bfloat16, out.dtype

    out_f32 = out.astype(jnp.float32)
    ref_bf16 = _reference_bf16(noise, att, w1, b1, w2, b2)
    ref_f32 = _reference_f32(noise, att, w1, b1, w2, b2)
    # Tight check vs a reference with matching bf16-in/f32-acc numerics
    # (tolerance covers the final bf16 output rounding), loose check vs pure f32.
    assert jnp.allclose(out_f32, ref_bf16, atol=1e-3, rtol=1e-2), "mismatch vs bf16 reference"
    assert jnp.allclose(out_f32, ref_f32, atol=2e-2, rtol=2e-2), "mismatch vs f32 reference"

    print("KERNEL_OK")
</pallas_src>

<mosaic_0001>
module attributes {stable_mosaic.version = 11 : i64} {
  func.func @_mlp_g_kernel(%arg0: i32, %arg1: memref<16x128xbf16, #tpu.memory_space<vmem>>, %arg2: memref<16x128xbf16, #tpu.memory_space<vmem>>, %arg3: memref<128x128xbf16, #tpu.memory_space<vmem>>, %arg4: memref<128x128xbf16, #tpu.memory_space<vmem>>, %arg5: memref<1x128xf32, #tpu.memory_space<vmem>>, %arg6: memref<128x128xbf16, #tpu.memory_space<vmem>>, %arg7: memref<1x128xf32, #tpu.memory_space<vmem>>, %arg8: memref<16x128xbf16, #tpu.memory_space<vmem>>) attributes {dimension_semantics = [#tpu.dimension_semantics<parallel>], iteration_bounds = array<i64: 1>, scalar_prefetch = 0 : i64, scratch_operands = 0 : i64, tpu.core_type = #tpu.core_type<tc>, window_params = [{transform_indices = @transform_0, window_bounds = array<i64: 16, 128>}, {transform_indices = @transform_1, window_bounds = array<i64: 16, 128>}, {pipeline_mode = #tpu.pipeline_mode<synchronous>, transform_indices = @transform_2, window_bounds = array<i64: 128, 128>}, {pipeline_mode = #tpu.pipeline_mode<synchronous>, transform_indices = @transform_3, window_bounds = array<i64: 128, 128>}, {pipeline_mode = #tpu.pipeline_mode<synchronous>, transform_indices = @transform_4, window_bounds = array<i64: 1, 128>}, {pipeline_mode = #tpu.pipeline_mode<synchronous>, transform_indices = @transform_5, window_bounds = array<i64: 128, 128>}, {pipeline_mode = #tpu.pipeline_mode<synchronous>, transform_indices = @transform_6, window_bounds = array<i64: 1, 128>}, {transform_indices = @transform_7, window_bounds = array<i64: 16, 128>}]} {
    %c0 = arith.constant 0 : index
    %c0_0 = arith.constant 0 : index
    %0 = vector.load %arg1[%c0, %c0_0] : memref<16x128xbf16, #tpu.memory_space<vmem>>, vector<16x128xbf16>
    %c0_1 = arith.constant 0 : index
    %c0_2 = arith.constant 0 : index
    %1 = vector.load %arg3[%c0_1, %c0_2] : memref<128x128xbf16, #tpu.memory_space<vmem>>, vector<128x128xbf16>
    %cst = arith.constant dense<0.000000e+00> : vector<16x128xf32>
    %2 = tpu.matmul %0, %1, %cst {dimension_numbers = #tpu.dot_dimension_numbers<[1], [0], [0], [1], [0, 0, 1, 1], [], []>} : vector<16x128xbf16>, vector<128x128xbf16>, vector<16x128xf32> -> vector<16x128xf32>
    %c0_3 = arith.constant 0 : index
    %c0_4 = arith.constant 0 : index
    %3 = vector.load %arg2[%c0_3, %c0_4] : memref<16x128xbf16, #tpu.memory_space<vmem>>, vector<16x128xbf16>
    %c0_5 = arith.constant 0 : index
    %c0_6 = arith.constant 0 : index
    %4 = vector.load %arg4[%c0_5, %c0_6] : memref<128x128xbf16, #tpu.memory_space<vmem>>, vector<128x128xbf16>
    %cst_7 = arith.constant dense<0.000000e+00> : vector<16x128xf32>
    %5 = tpu.matmul %3, %4, %cst_7 {dimension_numbers = #tpu.dot_dimension_numbers<[1], [0], [0], [1], [0, 0, 1, 1], [], []>} : vector<16x128xbf16>, vector<128x128xbf16>, vector<16x128xf32> -> vector<16x128xf32>
    %6 = arith.addf %2, %5 : vector<16x128xf32>
    %c0_8 = arith.constant 0 : index
    %c0_9 = arith.constant 0 : index
    %7 = vector.load %arg5[%c0_8, %c0_9] : memref<1x128xf32, #tpu.memory_space<vmem>>, vector<1x128xf32>
    %8 = vector.broadcast %7 : vector<1x128xf32> to vector<16x128xf32>
    %9 = arith.addf %6, %8 : vector<16x128xf32>
    %cst_10 = arith.constant 2.000000e-01 : f32
    %10 = vector.broadcast %cst_10 : f32 to vector<16x128xf32>
    %11 = arith.mulf %10, %9 : vector<16x128xf32>
    %12 = arith.maximumf %9, %11 : vector<16x128xf32>
    %13 = arith.truncf %12 : vector<16x128xf32> to vector<16x128xbf16>
    %c0_11 = arith.constant 0 : index
    %c0_12 = arith.constant 0 : index
    %14 = vector.load %arg6[%c0_11, %c0_12] : memref<128x128xbf16, #tpu.memory_space<vmem>>, vector<128x128xbf16>
    %cst_13 = arith.constant dense<0.000000e+00> : vector<16x128xf32>
    %15 = tpu.matmul %13, %14, %cst_13 {dimension_numbers = #tpu.dot_dimension_numbers<[1], [0], [0], [1], [0, 0, 1, 1], [], []>} : vector<16x128xbf16>, vector<128x128xbf16>, vector<16x128xf32> -> vector<16x128xf32>
    %c0_14 = arith.constant 0 : index
    %c0_15 = arith.constant 0 : index
    %16 = vector.load %arg7[%c0_14, %c0_15] : memref<1x128xf32, #tpu.memory_space<vmem>>, vector<1x128xf32>
    %17 = vector.broadcast %16 : vector<1x128xf32> to vector<16x128xf32>
    %18 = arith.addf %15, %17 : vector<16x128xf32>
    %cst_16 = arith.constant 0.000000e+00 : f32
    %19 = vector.broadcast %cst_16 : f32 to vector<16x128xf32>
    %20 = arith.maximumf %18, %19 : vector<16x128xf32>
    %21 = arith.truncf %20 : vector<16x128xf32> to vector<16x128xbf16>
    %c0_17 = arith.constant 0 : index
    %c0_18 = arith.constant 0 : index
    %22 = vector.load %arg8[%c0_17, %c0_18] : memref<16x128xbf16, #tpu.memory_space<vmem>>, vector<16x128xbf16>
    tpu.vector_store %arg8[%c0_17, %c0_18], %21 {strides = array<i32>} : memref<16x128xbf16, #tpu.memory_space<vmem>>, vector<16x128xbf16>,
    return
  }
  func.func @transform_0(%arg0: i32) -> (i32, i32) {
    %c0_i32 = arith.constant 0 : i32
    %c0_i32_0 = arith.constant 0 : i32
    return %arg0, %c0_i32 : i32, i32
  }
  func.func @transform_1(%arg0: i32) -> (i32, i32) {
    %c0_i32 = arith.constant 0 : i32
    %c0_i32_0 = arith.constant 0 : i32
    return %arg0, %c0_i32 : i32, i32
  }
  func.func @transform_2(%arg0: i32) -> (i32, i32) {
    %c0_i32 = arith.constant 0 : i32
    %c0_i32_0 = arith.constant 0 : i32
    %c0_i32_1 = arith.constant 0 : i32
    return %c0_i32, %c0_i32_0 : i32, i32
  }
  func.func @transform_3(%arg0: i32) -> (i32, i32) {
    %c0_i32 = arith.constant 0 : i32
    %c0_i32_0 = arith.constant 0 : i32
    %c0_i32_1 = arith.constant 0 : i32
    return %c0_i32, %c0_i32_0 : i32, i32
  }
  func.func @transform_4(%arg0: i32) -> (i32, i32) {
    %c0_i32 = arith.constant 0 : i32
    %c0_i32_0 = arith.constant 0 : i32
    %c0_i32_1 = arith.constant 0 : i32
    return %c0_i32, %c0_i32_0 : i32, i32
  }
  func.func @transform_5(%arg0: i32) -> (i32, i32) {
    %c0_i32 = arith.constant 0 : i32
    %c0_i32_0 = arith.constant 0 : i32
    %c0_i32_1 = arith.constant 0 : i32
    return %c0_i32, %c0_i32_0 : i32, i32
  }
  func.func @transform_6(%arg0: i32) -> (i32, i32) {
    %c0_i32 = arith.constant 0 : i32
    %c0_i32_0 = arith.constant 0 : i32
    %c0_i32_1 = arith.constant 0 : i32
    return %c0_i32, %c0_i32_0 : i32, i32
  }
  func.func @transform_7(%arg0: i32) -> (i32, i32) {
    %c0_i32 = arith.constant 0 : i32
    %c0_i32_0 = arith.constant 0 : i32
    return %arg0, %c0_i32 : i32, i32
  }
}

</mosaic_0001>

<bundles_post_ra>
// kernel: tpu_custom_call.1
= control target key start
LH: loop header
LB: loop body
LE: loop exit
PB: predicated region body
PF: predicated region fallthrough
CT: control target
= control target key end

     0   :  { %12 = vsyncpa [#allocation3], 0  ;;  %s969_s0 = inlined_call_operand.hbm [shape: bf16[16,128], index: 0, kind: input, shape index: {}]   ;;  %s970_s1 = inlined_call_operand.hbm [shape: bf16[16,128], index: 1, kind: input, shape index: {}]   ;;  %s971_s2 = inlined_call_operand.hbm [shape: bf16[128,128], index: 2, kind: input, shape index: {}]   ;;  %s972_s3 = inlined_call_operand.hbm [shape: bf16[128,128], index: 3, kind: input, shape index: {}]   ;;  %s973_s4 = inlined_call_operand.vmem [shape: f32[1,128], index: 4, kind: input, shape index: {}]   ;;  %s974_s5 = inlined_call_operand.hbm [shape: bf16[128,128], index: 5, kind: input, shape index: {}]   ;;  %s975_s6 = inlined_call_operand.vmem [shape: f32[1,128], index: 6, kind: input, shape index: {}]   ;;  %s976_s7 = inlined_call_operand.hbm [shape: bf16[16,128], index: 7, kind: output, shape index: {}]  }
   0x1   :  { %13 = vsyncpa [#allocation6], 0 }
   0x2   :  { %14 = vsyncpa [#allocation9], 0 }
   0x3   :  { %15 = vsyncpa [#allocation4], 0  ;;  %s779_s24 = smov [#allocation5]   ;;  %s780_s26 = smov [#allocation8]  }
   0x4   :  { %s33_s25 = sshll.u32 %s779_s24, 4  ;;  %s57_s27 = sshll.u32 %s780_s26, 4  ;;  %s34_s25 = int_to_ptr.vmem [resolvable:$true] %s33_s25  ;;  %s829_s27 = int_to_ptr.vmem [resolvable:$true] %s57_s27 }
   0x5   :  { %s639_s30 = scalar_lea.hbm %s970_s1, 128 }
   0x6   :  { %p640_p0 = scmp.ne.s32.totalorder %s970_s1, %s639_s30  ;;  %p643_p1 = scmp.lt.u32.totalorder %s639_s30, %s970_s1 }
   0x8   :  { %p645_p2 = pnand %p643_p1, %p640_p0 }
   0xa   :  { %648 = shalt.err (!%p645_p2)
}
   0xb   :  { %s649_s12 = scalar_lea.vmem %s34_s25, 128  ;;  %p654_p4 = scmp.lt.s32.totalorder %s34_s25, %s34_s25 }
   0xc   :  { %p650_p3 = scmp.ne.s32.totalorder %s34_s25, %s649_s12  ;;  %p655_p5 = scmp.lt.s32.totalorder %s649_s12, %s649_s12 }
   0xe   :  { %p656_p6 = por %p655_p5, %p654_p4 }
  0x10   :  { %p657_p7 = pnand %p656_p6, %p650_p3 }
  0x12   :  { %660 = shalt.err (!%p657_p7)
}
  0x13   :  { %s781_s13 = smov 64   ;;  %s782_s14 = smov 4  }
  0x14   :  { %39 = dma.hbm_to_vmem [thread:$0]  %s970_s1, 128, %s34_s25, [#allocation6], %s781_s13, %s781_s13, %s782_s14  }
  0x15   :  { %s661_s19 = scalar_lea.hbm %s972_s3, 1024 }
  0x16   :  { %p662_p8 = scmp.ne.s32.totalorder %s972_s3, %s661_s19  ;;  %p665_p9 = scmp.lt.u32.totalorder %s661_s19, %s972_s3 }
  0x18   :  { %p667_p10 = pnand %p665_p9, %p662_p8 }
  0x1a   :  { %670 = shalt.err (!%p667_p10)
}
  0x1b   :  { %s671_s24 = scalar_lea.vmem %s829_s27, 1024  ;;  %p676_p12 = scmp.lt.s32.totalorder %s829_s27, %s829_s27 }
  0x1c   :  { %p672_p11 = scmp.ne.s32.totalorder %s829_s27, %s671_s24  ;;  %p677_p13 = scmp.lt.s32.totalorder %s671_s24, %s671_s24 }
  0x1e   :  { %p678_p0 = por %p677_p13, %p676_p12 }
  0x20   :  { %p679_p1 = pnand %p678_p0, %p672_p11 }
  0x22   :  { %682 = shalt.err (!%p679_p1)
}
  0x23   :  { %63 = dma.hbm_to_vmem [thread:$0]  %s972_s3, 1024, %s829_s27, [#allocation9], %s781_s13, %s781_s13, %s782_s14  }
  0x24   :  { %s783_s26 = smov [#allocation2]   ;;  %s784_s29 = smov [#allocation7]  }
  0x25   :  { %s21_s28 = sshll.u32 %s783_s26, 4  ;;  %s45_s30 = sshll.u32 %s784_s29, 4  ;;  %s22_s28 = int_to_ptr.vmem [resolvable:$true] %s21_s28  ;;  %s866_s30 = int_to_ptr.vmem [resolvable:$true] %s45_s30 }
  0x26   :  { %s683_s10 = scalar_lea.hbm %s969_s0, 128 }
  0x27   :  { %p684_p2 = scmp.ne.s32.totalorder %s969_s0, %s683_s10  ;;  %p687_p3 = scmp.lt.u32.totalorder %s683_s10, %s969_s0 }
  0x29   :  { %p689_p4 = pnand %p687_p3, %p684_p2 }
  0x2b   :  { %692 = shalt.err (!%p689_p4)
}
  0x2c   :  { %s693_s3 = scalar_lea.vmem %s22_s28, 128  ;;  %p698_p6 = scmp.lt.s32.totalorder %s22_s28, %s22_s28 }
  0x2d   :  { %p694_p5 = scmp.ne.s32.totalorder %s22_s28, %s693_s3  ;;  %p699_p7 = scmp.lt.s32.totalorder %s693_s3, %s693_s3 }
  0x2f   :  { %p700_p8 = por %p699_p7, %p698_p6 }
  0x31   :  { %p701_p9 = pnand %p700_p8, %p694_p5 }
  0x33   :  { %704 = shalt.err (!%p701_p9)
}
  0x34   :  { %27 = dma.hbm_to_vmem [thread:$0]  %s969_s0, 128, %s22_s28, [#allocation3], %s781_s13, %s781_s13, %s782_s14  }
  0x35   :  { %s705_s20 = scalar_lea.hbm %s971_s2, 1024 }
  0x36   :  { %p706_p10 = scmp.ne.s32.totalorder %s971_s2, %s705_s20  ;;  %p709_p11 = scmp.lt.u32.totalorder %s705_s20, %s971_s2 }
  0x38   :  { %p711_p12 = pnand %p709_p11, %p706_p10 }
  0x3a   :  { %714 = shalt.err (!%p711_p12)
}
  0x3b   :  { %s715_s1 = scalar_lea.vmem %s866_s30, 1024  ;;  %p720_p0 = scmp.lt.s32.totalorder %s866_s30, %s866_s30 }
  0x3c   :  { %p716_p13 = scmp.ne.s32.totalorder %s866_s30, %s715_s1  ;;  %p721_p1 = scmp.lt.s32.totalorder %s715_s1, %s715_s1 }
  0x3e   :  { %p722_p2 = por %p721_p1, %p720_p0 }
  0x40   :  { %p723_p3 = pnand %p722_p2, %p716_p13 }
  0x42   :  { %726 = shalt.err (!%p723_p3)
}
  0x43   :  { %51 = dma.hbm_to_vmem [thread:$0]  %s971_s2, 1024, %s866_s30, [#allocation6], %s781_s13, %s781_s13, %s782_s14  }
  0x44   :  { %s785_s26 = smov [#allocation10]   ;;  %s727_s9 = scalar_lea.hbm %s974_s5, 1024 }
  0x45   :  { %s71_s28 = sshll.u32 %s785_s26, 4  ;;  %p728_p4 = scmp.ne.s32.totalorder %s974_s5, %s727_s9  ;;  %s72_s28 = int_to_ptr.vmem [resolvable:$true] %s71_s28 }
  0x46   :  { %p731_p5 = scmp.lt.u32.totalorder %s727_s9, %s974_s5 }
  0x48   :  { %p733_p6 = pnand %p731_p5, %p728_p4 }
  0x4a   :  { %736 = shalt.err (!%p733_p6)
}
  0x4b   :  { %s737_s16 = scalar_lea.vmem %s72_s28, 1024  ;;  %p742_p8 = scmp.lt.s32.totalorder %s72_s28, %s72_s28 }
  0x4c   :  { %p738_p7 = scmp.ne.s32.totalorder %s72_s28, %s737_s16  ;;  %p743_p9 = scmp.lt.s32.totalorder %s737_s16, %s737_s16 }
  0x4e   :  { %p744_p10 = por %p743_p9, %p742_p8 }
  0x50   :  { %p745_p11 = pnand %p744_p10, %p738_p7 }
  0x52   :  { %748 = shalt.err (!%p745_p11)
}
  0x53   :  { %77 = dma.hbm_to_vmem [thread:$0]  %s974_s5, 1024, %s72_s28, [#allocation9], %s781_s13, %s781_s13, %s782_s14  }
  0x54   :  { %771 = dma.done.wait [#allocation3], 128  }
  0x55   :  { %772 = vsyncadd [#allocation3], 4294967168 }
  0x56   :  { %773 = dma.done.wait [#allocation6], 1152  }
  0x57   :  { %774 = vsyncadd [#allocation6], 4294966144 }
  0x58   :  { %775 = dma.done.wait [#allocation9], 2048  }
  0x59   :  { %776 = vsyncadd [#allocation9], 4294965248  ;;  %v786_v0 = vmov 0.0   ;;  %vm787_vm0 = vmmov 0   ;;  %v613_v1 = vld [vmem:[#allocation8] sm:$0xff]   ;;  %v615_v3 = vld [vmem:[#allocation8 + $0x8] sm:$0xff]  }
  0x5a   :  { %543 = vmatprep.subr.bf16.mxu0 %v786_v0  ;;  %563 = vmatprep.subr.bf16.mxu1 %v786_v0  ;;  %v614_v2 = vld [vmem:[#allocation7] sm:$0xff]   ;;  %v616_v4 = vld [vmem:[#allocation7 + $0x8] sm:$0xff]   ;;  %v617_v5 = vld [vmem:[#allocation8 + $0x10] sm:$0xff]  }
  0x5b   :  { %559 = vmatprep.mubr.msk.bf16.mxu0 %vm787_vm0, %v786_v0  ;;  %579 = vmatprep.mubr.msk.bf16.mxu1 %vm787_vm0, %v786_v0  ;;  %v618_v6 = vld [vmem:[#allocation7 + $0x10] sm:$0xff]   ;;  %v619_v7 = vld [vmem:[#allocation8 + $0x18] sm:$0xff]   ;;  %v621_v9 = vld [vmem:[#allocation8 + $0x20] sm:$0xff]  }
  0x5c   :  { %544 = vmatpush3.bf16.msra.mxu0 %v613_v1  ;;  %564 = vmatpush3.bf16.msra.mxu1 %v614_v2  ;;  %v620_v8 = vld [vmem:[#allocation7 + $0x18] sm:$0xff]   ;;  %v622_v10 = vld [vmem:[#allocation7 + $0x20] sm:$0xff]   ;;  %v623_v11 = vld [vmem:[#allocation8 + $0x28] sm:$0xff]  }
  0x5d   :  { %545 = vmatprep.subr.bf16.mxu0 %v786_v0  ;;  %565 = vmatprep.subr.bf16.mxu1 %v786_v0  ;;  %v624_v12 = vld [vmem:[#allocation7 + $0x28] sm:$0xff]   ;;  %v625_v13 = vld [vmem:[#allocation8 + $0x30] sm:$0xff]   ;;  %v627_v15 = vld [vmem:[#allocation8 + $0x38] sm:$0xff]  }
  0x5e   :  { %v626_v14 = vld [vmem:[#allocation7 + $0x30] sm:$0xff]   ;;  %v628_v16 = vld [vmem:[#allocation7 + $0x38] sm:$0xff]   ;;  %v631_v19 = vld [vmem:[#allocation10] sm:$0xff]  }
  0x5f   :  { %v629_v17 = vld [vmem:[#allocation5] sm:$0xff]   ;;  %v630_v18 = vld [vmem:[#allocation2] sm:$0xff]   ;;  %v632_v20 = vld [vmem:[#allocation10 + $0x8] sm:$0xff]  }
  0x60   :  { %546 = vmatpush3.bf16.msra.mxu0 %v615_v3  ;;  %566 = vmatpush3.bf16.msra.mxu1 %v616_v4  ;;  %v633_v21 = vld [vmem:[#allocation10 + $0x10] sm:$0xff]   ;;  %v634_v22 = vld [vmem:[#allocation10 + $0x18] sm:$0xff]   ;;  %v635_v23 = vld [vmem:[#allocation10 + $0x20] sm:$0xff]  }
  0x61   :  { %547 = vmatprep.subr.bf16.mxu0 %v786_v0  ;;  %567 = vmatprep.subr.bf16.mxu1 %v786_v0  ;;  %v636_v24 = vld [vmem:[#allocation10 + $0x28] sm:$0xff]   ;;  %v637_v25 = vld [vmem:[#allocation10 + $0x30] sm:$0xff]   ;;  %v638_v26 = vld [vmem:[#allocation10 + $0x38] sm:$0xff]  }
  0x62   :  { %v497_v29 = vld [vmem:[%s973_s4] ss:$0 sm:$0xff]  ;;  %s788_s4 = smov [#allocation11]  }
  0x63   :  { %v498_v45 = vld [vmem:[%s975_s6] ss:$0 sm:$0xff]  ;;  %s465_s18 = sshll.u32 %s788_s4, 4  ;;  %s466_s18 = int_to_ptr.vmem [resolvable:$true] %s465_s18 }
  0x64   :  { %548 = vmatpush3.bf16.msra.mxu0 %v617_v5  ;;  %568 = vmatpush3.bf16.msra.mxu1 %v618_v6  ;;  %s749_s19 = scalar_lea.vmem %s466_s18, 128  ;;  %p754_p13 = scmp.lt.s32.totalorder %s466_s18, %s466_s18 }
  0x65   :  { %549 = vmatprep.subr.bf16.mxu0 %v786_v0  ;;  %569 = vmatprep.subr.bf16.mxu1 %v786_v0  ;;  %p750_p12 = scmp.ne.s32.totalorder %s466_s18, %s749_s19  ;;  %p755_p0 = scmp.lt.s32.totalorder %s749_s19, %s749_s19 }
  0x67   :  { %p756_p1 = por %p755_p0, %p754_p13 }
  0x68   :  { %550 = vmatpush3.bf16.msra.mxu0 %v619_v7  ;;  %570 = vmatpush3.bf16.msra.mxu1 %v620_v8 }
  0x69   :  { %551 = vmatprep.subr.bf16.mxu0 %v786_v0  ;;  %571 = vmatprep.subr.bf16.mxu1 %v786_v0  ;;  %p757_p2 = pnand %p756_p1, %p750_p12 }
  0x6c   :  { %552 = vmatpush3.bf16.msra.mxu0 %v621_v9  ;;  %572 = vmatpush3.bf16.msra.mxu1 %v622_v10 }
  0x6d   :  { %553 = vmatprep.subr.bf16.mxu0 %v786_v0  ;;  %573 = vmatprep.subr.bf16.mxu1 %v786_v0 }
  0x70   :  { %554 = vmatpush3.bf16.msra.mxu0 %v623_v11  ;;  %574 = vmatpush3.bf16.msra.mxu1 %v624_v12 }
  0x71   :  { %555 = vmatprep.subr.bf16.mxu0 %v786_v0  ;;  %575 = vmatprep.subr.bf16.mxu1 %v786_v0 }
  0x74   :  { %556 = vmatpush3.bf16.msra.mxu0 %v625_v13  ;;  %576 = vmatpush3.bf16.msra.mxu1 %v626_v14 }
  0x75   :  { %557 = vmatprep.subr.bf16.mxu0 %v786_v0  ;;  %577 = vmatprep.subr.bf16.mxu1 %v786_v0 }
  0x78   :  { %558 = vmatpush3.bf16.msra.mxu0 %v627_v15  ;;  %578 = vmatpush3.bf16.msra.mxu1 %v628_v16 }
  0x79   :  { %583 = vmatprep.subr.bf16.mxu0 %v786_v0 }
  0x7b   :  { %560 = vmatmul.mubr.bf16.vlgmr.msra.gmra.mrb[0].mxu0 %v629_v17  ;;  %580 = vmatmul.mubr.bf16.vlgmr.msra.gmra.mrb[0].mxu1 %v630_v18 }
  0x7c   :  { %584 = vmatpush3.bf16.msra.mxu0 %v631_v19  ;;  %599 = vmatprep.mubr.msk.bf16.mxu0 %vm787_vm0, %v786_v0 }
  0x7d   :  { %585 = vmatprep.subr.bf16.mxu0 %v786_v0 }
  0x80   :  { %586 = vmatpush3.bf16.msra.mxu0 %v632_v20 }
  0x81   :  { %587 = vmatprep.subr.bf16.mxu0 %v786_v0 }
  0x84   :  { %588 = vmatpush3.bf16.msra.mxu0 %v633_v21 }
  0x85   :  { %589 = vmatprep.subr.bf16.mxu0 %v786_v0 }
  0x88   :  { %590 = vmatpush3.bf16.msra.mxu0 %v634_v22 }
  0x89   :  { %591 = vmatprep.subr.bf16.mxu0 %v786_v0 }
  0x8c   :  { %592 = vmatpush3.bf16.msra.mxu0 %v635_v23 }
  0x8d   :  { %593 = vmatprep.subr.bf16.mxu0 %v786_v0 }
  0x90   :  { %594 = vmatpush3.bf16.msra.mxu0 %v636_v24 }
  0x91   :  { %595 = vmatprep.subr.bf16.mxu0 %v786_v0 }
  0x94   :  { %596 = vmatpush3.bf16.msra.mxu0 %v637_v25 }
  0x95   :  { %597 = vmatprep.subr.bf16.mxu0 %v786_v0 }
  0x98   :  { %598 = vmatpush3.bf16.msra.mxu0 %v638_v26 }
 0x14e   :  { %v220_v27 = vpop.f32.mrb[0].mxu0  ;;  %v315_v28 = vpop.f32.mrb[0].mxu1 }
 0x14f   :  { %v561_v30 = vpop.f32.mrb[1].mxu0  ;;  %v316_v31 = vadd.f32 %v315_v28, %v220_v27  ;;  %v581_v32 = vpop.f32.mrb[1].mxu1 }
 0x150   :  { %v223_v33 = vpop.f32.mrb[2].mxu0  ;;  %v318_v34 = vpop.f32.mrb[2].mxu1 }
 0x151   :  { %v562_v35 = vpop.f32.mrb[3].mxu0  ;;  %v329_v36 = vadd.f32 %v497_v29, %v316_v31  ;;  %v319_v37 = vadd.f32 %v318_v34, %v223_v33  ;;  %v582_v38 = vpop.f32.mrb[3].mxu1 }
 0x153   :  { %v331_v39 = vmul.f32 0.2, %v329_v36  ;;  %v330_v40 = vadd.f32 %v497_v29, %v319_v37 }
 0x155   :  { %v332_v41 = vmul.f32 0.2, %v330_v40  ;;  %v333_v42 = vmax.f32 %v329_v36, %v331_v39 }
 0x157   :  { %v334_v43 = vmax.f32 %v330_v40, %v332_v41 }
 0x159   :  { %v335_v44 = vpack.c.bf16 %v334_v43, %v333_v42 }
 0x15b   :  { %600 = vmatmul.mubr.bf16.vlgmr.msra.gmra.mrb[4].mxu0 %v335_v44 }
 0x22e   :  { %v441_v46 = vpop.f32.mrb[4].mxu0 }
 0x22f   :  { %v442_v47 = vadd.f32 %v498_v45, %v441_v46  ;;  %v601_v48 = vpop.f32.mrb[5].mxu0 }
 0x230   :  { %v444_v49 = vpop.f32.mrb[6].mxu0 }
 0x231   :  { %v445_v50 = vadd.f32 %v498_v45, %v444_v49  ;;  %v602_v51 = vpop.f32.mrb[7].mxu0  ;;  %v448_v52 = vmax.f32 %v442_v47, 0.0 }
 0x233   :  { %v449_v53 = vmax.f32 %v445_v50, 0.0 }
 0x235   :  { %v514_v54 = vpack.c.bf16 %v449_v53, %v448_v52 }
 0x237   :  { %515 = vst [vmem:[#allocation11] sm:$0xff] %v514_v54  }
 0x238   :  { %760 = shalt.err (!%p757_p2)
}
 0x239   :  { %s761_s21 = scalar_lea.hbm %s976_s7, 128 }
 0x23a   :  { %p762_p3 = scmp.ne.s32.totalorder %s976_s7, %s761_s21  ;;  %p765_p4 = scmp.lt.u32.totalorder %s761_s21, %s976_s7 }
 0x23c   :  { %p767_p5 = pnand %p765_p4, %p762_p3 }
 0x23e   :  { %770 = shalt.err (!%p767_p5)
}
 0x23f   :  { %471 = dma.vmem_to_hbm [thread:$0]  %s466_s18, 128, %s976_s7, [#allocation4], %s781_s13, %s781_s13, %s782_s14  }
 0x240   :  { %777 = dma.done.wait [#allocation4], 128  }
 0x241   :  { %778 = vsyncadd [#allocation4], 4294967168 }
 0x242   :  { %475 = vsyncpa [#allocation3], 1 }
 0x243   :  { %476 = vsyncpa [#allocation6], 1 }
 0x244   :  { %477 = vsyncpa [#allocation9], 1 }
 0x245   :  { %478 = vsyncpa [#allocation4], 1 }

</bundles_post_ra>
